<compile_context>
chip_gen: v5e
topology: v5e:2x2
jax: 0.10.0
libtpu: 0.0.40
codegen_flags: <defaults>
</compile_context>

<pallas_src>
import jax
import jax.numpy as jnp
import numpy as np
from jax.experimental import pallas as pl
from jax.experimental.pallas import tpu as pltpu


def _round_up(x: int, m: int) -> int:
    return ((x + m - 1) // m) * m


def _lili_decoder_kernel(latent_ref, state_ref, w1l_t_ref, w1s_t_ref, b1_ref,
                         w2_t_ref, b2_ref, out_ref):
    # latent: (bt, L), state: (bt, 2) -- natural row-major blocks, batch on sublanes.
    lat = latent_ref[...]
    st = state_ref[...]
    w1s_t = w1s_t_ref[...]                                   # (2, 16)

    # hidden = relu(latent @ W1_latent^T + rank-2 state update + b1)  -> (bt, 16)
    h = jnp.dot(lat, w1l_t_ref[...],
                preferred_element_type=jnp.float32)          # MXU: (bt, L) @ (L, 16)
    # State contribution as two VPU broadcast FMAs (avoids a K=2 MXU pass).
    h = h + st[:, 0:1] * w1s_t[0:1, :] + st[:, 1:2] * w1s_t[1:2, :] + b1_ref[...]
    h = jnp.maximum(h, 0.0)

    # output = hidden @ W2^T + b2  -> (bt, 2); stored directly, masked vst is hidden
    # under DMA in this memory-bound kernel.
    out = jnp.dot(h, w2_t_ref[...],
                  preferred_element_type=jnp.float32) + b2_ref[...]
    out_ref[...] = out.astype(out_ref.dtype)


def _reference(latent, state, w1, b1, w2, b2):
    x = jnp.concatenate([latent, state], axis=-1)
    h = jnp.maximum(x @ w1.T + b1, 0.0)
    return h @ w2.T + b2


def lili_decoder(latent, state, w1, b1, w2, b2, *, block_b=8192,
                 small_batch_fallback=1024):
    """Pallas forward pass of LILIDecoder.

    latent: (B, L), state: (B, 2)
    w1: (16, L+2), b1: (16,), w2: (2, 16), b2: (2,)  -- PyTorch Linear layout.
    Returns (B, 2) float32.
    """
    B, L = latent.shape
    assert state.shape == (B, 2)
    assert w1.shape == (16, L + 2) and b1.shape == (16,)
    assert w2.shape == (2, 16) and b2.shape == (2,)

    latent = latent.astype(jnp.float32)
    state = state.astype(jnp.float32)

    # For tiny batches the fixed pallas_call / grid-step overhead dominates: take
    # the plain jnp path. (The test passes small_batch_fallback=0 to force Pallas.)
    if B < small_batch_fallback:
        return _reference(latent, state, w1.astype(jnp.float32),
                          b1.astype(jnp.float32), w2.astype(jnp.float32),
                          b2.astype(jnp.float32))

    # Batch tile on the sublane axis: multiple of 8, capped at block_b and at B.
    bt = max(8, min(_round_up(block_b, 8), _round_up(B, 8)))
    grid = (pl.cdiv(B, bt),)

    # Pre-transpose the tiny weights once so the kernel never relayouts anything.
    w1l_t = jnp.transpose(w1[:, :L]).astype(jnp.float32)     # (L, 16)
    w1s_t = jnp.transpose(w1[:, L:]).astype(jnp.float32)     # (2, 16)
    b1r = b1.reshape(1, 16).astype(jnp.float32)              # (1, 16)
    w2_t = jnp.transpose(w2).astype(jnp.float32)             # (16, 2)
    b2r = b2.reshape(1, 2).astype(jnp.float32)               # (1, 2)

    const = lambda i: (0, 0)  # weights/biases: same (full) block every grid step

    out = pl.pallas_call(
        _lili_decoder_kernel,
        out_shape=jax.ShapeDtypeStruct((B, 2), jnp.float32),
        grid=grid,
        in_specs=[
            pl.BlockSpec((bt, L), lambda i: (i, 0)),   # latent, streamed over batch
            pl.BlockSpec((bt, 2), lambda i: (i, 0)),   # state,  streamed over batch
            pl.BlockSpec((L, 16), const),              # W1 (latent part, transposed)
            pl.BlockSpec((2, 16), const),              # W1 (state part, transposed)
            pl.BlockSpec((1, 16), const),              # b1
            pl.BlockSpec((16, 2), const),              # W2 (transposed)
            pl.BlockSpec((1, 2), const),               # b2
        ],
        out_specs=pl.BlockSpec((bt, 2), lambda i: (i, 0)),
        compiler_params=pltpu.CompilerParams(
            dimension_semantics=("parallel",),         # megacore sharding on v7x
            # (bt,L)/(bt,2)/(bt,2) blocks lane-pad to 128 in VMEM: ~12 MiB/step,
            # ~24 MiB double-buffered at bt=8192 plus a few MiB of temporaries.
            # 48 MiB fits v5e/v6e (128 MiB phys) and v7x (64 MiB phys).
            vmem_limit_bytes=48 * 1024 * 1024,
        ),
    )(latent, state, w1l_t, w1s_t, b1r, w2_t, b2r)

    return out


if __name__ == "__main__":
    latent_size = 8
    batch = 8

    key = jax.random.PRNGKey(0)
    k_lat, k_st, k_w1, k_b1, k_w2, k_b2 = jax.random.split(key, 6)

    latent = jax.random.normal(k_lat, (batch, latent_size), dtype=jnp.float32)
    state = jax.random.normal(k_st, (batch, 2), dtype=jnp.float32)

    # Deterministic PyTorch-style Linear init: U(-1/sqrt(fan_in), 1/sqrt(fan_in)).
    in1 = latent_size + 2
    bound1 = 1.0 / np.sqrt(in1)
    w1 = jax.random.uniform(k_w1, (16, in1), jnp.float32, -bound1, bound1)
    b1 = jax.random.uniform(k_b1, (16,), jnp.float32, -bound1, bound1)
    bound2 = 1.0 / np.sqrt(16)
    w2 = jax.random.uniform(k_w2, (2, 16), jnp.float32, -bound2, bound2)
    b2 = jax.random.uniform(k_b2, (2,), jnp.float32, -bound2, bound2)

    # Force the Pallas path (fallback threshold 0) so the kernel is exercised.
    out = lili_decoder(latent, state, w1, b1, w2, b2, small_batch_fallback=0)
    out = jax.block_until_ready(out)
    ref = _reference(latent, state, w1, b1, w2, b2)
    np.testing.assert_allclose(np.asarray(out), np.asarray(ref),
                               rtol=1e-5, atol=1e-5)

    # Second check: multi-block grid with a ragged last block (B=300, bt=128).
    k2_lat, k2_st = jax.random.split(jax.random.PRNGKey(1), 2)
    latent2 = jax.random.normal(k2_lat, (300, latent_size), dtype=jnp.float32)
    state2 = jax.random.normal(k2_st, (300, 2), dtype=jnp.float32)
    out2 = lili_decoder(latent2, state2, w1, b1, w2, b2,
                        block_b=128, small_batch_fallback=0)
    out2 = jax.block_until_ready(out2)
    ref2 = _reference(latent2, state2, w1, b1, w2, b2)
    np.testing.assert_allclose(np.asarray(out2), np.asarray(ref2),
                               rtol=1e-5, atol=1e-5)

    print("KERNEL_OK")
</pallas_src>

<mosaic_0001>
module attributes {stable_mosaic.version = 11 : i64} {
  func.func @_lili_decoder_kernel(%arg0: i32, %arg1: memref<8x8xf32, #tpu.memory_space<vmem>>, %arg2: memref<8x2xf32, #tpu.memory_space<vmem>>, %arg3: memref<8x16xf32, #tpu.memory_space<vmem>>, %arg4: memref<2x16xf32, #tpu.memory_space<vmem>>, %arg5: memref<1x16xf32, #tpu.memory_space<vmem>>, %arg6: memref<16x2xf32, #tpu.memory_space<vmem>>, %arg7: memref<1x2xf32, #tpu.memory_space<vmem>>, %arg8: memref<8x2xf32, #tpu.memory_space<vmem>>) attributes {dimension_semantics = [#tpu.dimension_semantics<parallel>], iteration_bounds = array<i64: 1>, scalar_prefetch = 0 : i64, scratch_operands = 0 : i64, tpu.core_type = #tpu.core_type<tc>, window_params = [{transform_indices = @transform_0, window_bounds = array<i64: 8, 8>}, {transform_indices = @transform_1, window_bounds = array<i64: 8, 2>}, {pipeline_mode = #tpu.pipeline_mode<synchronous>, transform_indices = @transform_2, window_bounds = array<i64: 8, 16>}, {pipeline_mode = #tpu.pipeline_mode<synchronous>, transform_indices = @transform_3, window_bounds = array<i64: 2, 16>}, {pipeline_mode = #tpu.pipeline_mode<synchronous>, transform_indices = @transform_4, window_bounds = array<i64: 1, 16>}, {pipeline_mode = #tpu.pipeline_mode<synchronous>, transform_indices = @transform_5, window_bounds = array<i64: 16, 2>}, {pipeline_mode = #tpu.pipeline_mode<synchronous>, transform_indices = @transform_6, window_bounds = array<i64: 1, 2>}, {transform_indices = @transform_7, window_bounds = array<i64: 8, 2>}]} {
    %c0 = arith.constant 0 : index
    %c0_0 = arith.constant 0 : index
    %0 = vector.load %arg1[%c0, %c0_0] : memref<8x8xf32, #tpu.memory_space<vmem>>, vector<8x8xf32>
    %c0_1 = arith.constant 0 : index
    %c0_2 = arith.constant 0 : index
    %1 = vector.load %arg2[%c0_1, %c0_2] : memref<8x2xf32, #tpu.memory_space<vmem>>, vector<8x2xf32>
    %c0_3 = arith.constant 0 : index
    %c0_4 = arith.constant 0 : index
    %2 = vector.load %arg4[%c0_3, %c0_4] : memref<2x16xf32, #tpu.memory_space<vmem>>, vector<2x16xf32>
    %c0_5 = arith.constant 0 : index
    %c0_6 = arith.constant 0 : index
    %3 = vector.load %arg3[%c0_5, %c0_6] : memref<8x16xf32, #tpu.memory_space<vmem>>, vector<8x16xf32>
    %cst = arith.constant dense<0.000000e+00> : vector<8x16xf32>
    %4 = tpu.matmul %0, %3, %cst {dimension_numbers = #tpu.dot_dimension_numbers<[1], [0], [0], [1], [0, 0, 1, 1], [], []>} : vector<8x8xf32>, vector<8x16xf32>, vector<8x16xf32> -> vector<8x16xf32>
    %5 = vector.extract_strided_slice %1 {offsets = [0, 0], sizes = [8, 1], strides = [1, 1]} : vector<8x2xf32> to vector<8x1xf32>
    %6 = vector.extract_strided_slice %2 {offsets = [0, 0], sizes = [1, 16], strides = [1, 1]} : vector<2x16xf32> to vector<1x16xf32>
    %7 = vector.broadcast %5 : vector<8x1xf32> to vector<8x16xf32>
    %8 = vector.broadcast %6 : vector<1x16xf32> to vector<8x16xf32>
    %9 = arith.mulf %7, %8 : vector<8x16xf32>
    %10 = arith.addf %4, %9 : vector<8x16xf32>
    %11 = vector.extract_strided_slice %1 {offsets = [0, 1], sizes = [8, 1], strides = [1, 1]} : vector<8x2xf32> to vector<8x1xf32>
    %12 = vector.extract_strided_slice %2 {offsets = [1, 0], sizes = [1, 16], strides = [1, 1]} : vector<2x16xf32> to vector<1x16xf32>
    %13 = vector.broadcast %11 : vector<8x1xf32> to vector<8x16xf32>
    %14 = vector.broadcast %12 : vector<1x16xf32> to vector<8x16xf32>
    %15 = arith.mulf %13, %14 : vector<8x16xf32>
    %16 = arith.addf %10, %15 : vector<8x16xf32>
    %c0_7 = arith.constant 0 : index
    %c0_8 = arith.constant 0 : index
    %17 = vector.load %arg5[%c0_7, %c0_8] : memref<1x16xf32, #tpu.memory_space<vmem>>, vector<1x16xf32>
    %18 = vector.broadcast %17 : vector<1x16xf32> to vector<8x16xf32>
    %19 = arith.addf %16, %18 : vector<8x16xf32>
    %cst_9 = arith.constant 0.000000e+00 : f32
    %20 = vector.broadcast %cst_9 : f32 to vector<8x16xf32>
    %21 = arith.maximumf %19, %20 : vector<8x16xf32>
    %c0_10 = arith.constant 0 : index
    %c0_11 = arith.constant 0 : index
    %22 = vector.load %arg6[%c0_10, %c0_11] : memref<16x2xf32, #tpu.memory_space<vmem>>, vector<16x2xf32>
    %cst_12 = arith.constant dense<0.000000e+00> : vector<8x2xf32>
    %23 = tpu.matmul %21, %22, %cst_12 {dimension_numbers = #tpu.dot_dimension_numbers<[1], [0], [0], [1], [0, 0, 1, 1], [], []>} : vector<8x16xf32>, vector<16x2xf32>, vector<8x2xf32> -> vector<8x2xf32>
    %c0_13 = arith.constant 0 : index
    %c0_14 = arith.constant 0 : index
    %24 = vector.load %arg7[%c0_13, %c0_14] : memref<1x2xf32, #tpu.memory_space<vmem>>, vector<1x2xf32>
    %25 = vector.broadcast %24 : vector<1x2xf32> to vector<8x2xf32>
    %26 = arith.addf %23, %25 : vector<8x2xf32>
    %c0_15 = arith.constant 0 : index
    %c0_16 = arith.constant 0 : index
    %27 = vector.load %arg8[%c0_15, %c0_16] : memref<8x2xf32, #tpu.memory_space<vmem>>, vector<8x2xf32>
    tpu.vector_store %arg8[%c0_15, %c0_16], %26 {strides = array<i32>} : memref<8x2xf32, #tpu.memory_space<vmem>>, vector<8x2xf32>,
    return
  }
  func.func @transform_0(%arg0: i32) -> (i32, i32) {
    %c0_i32 = arith.constant 0 : i32
    %c0_i32_0 = arith.constant 0 : i32
    return %arg0, %c0_i32 : i32, i32
  }
  func.func @transform_1(%arg0: i32) -> (i32, i32) {
    %c0_i32 = arith.constant 0 : i32
    %c0_i32_0 = arith.constant 0 : i32
    return %arg0, %c0_i32 : i32, i32
  }
  func.func @transform_2(%arg0: i32) -> (i32, i32) {
    %c0_i32 = arith.constant 0 : i32
    %c0_i32_0 = arith.constant 0 : i32
    %c0_i32_1 = arith.constant 0 : i32
    return %c0_i32, %c0_i32_0 : i32, i32
  }
  func.func @transform_3(%arg0: i32) -> (i32, i32) {
    %c0_i32 = arith.constant 0 : i32
    %c0_i32_0 = arith.constant 0 : i32
    %c0_i32_1 = arith.constant 0 : i32
    return %c0_i32, %c0_i32_0 : i32, i32
  }
  func.func @transform_4(%arg0: i32) -> (i32, i32) {
    %c0_i32 = arith.constant 0 : i32
    %c0_i32_0 = arith.constant 0 : i32
    %c0_i32_1 = arith.constant 0 : i32
    return %c0_i32, %c0_i32_0 : i32, i32
  }
  func.func @transform_5(%arg0: i32) -> (i32, i32) {
    %c0_i32 = arith.constant 0 : i32
    %c0_i32_0 = arith.constant 0 : i32
    %c0_i32_1 = arith.constant 0 : i32
    return %c0_i32, %c0_i32_0 : i32, i32
  }
  func.func @transform_6(%arg0: i32) -> (i32, i32) {
    %c0_i32 = arith.constant 0 : i32
    %c0_i32_0 = arith.constant 0 : i32
    %c0_i32_1 = arith.constant 0 : i32
    return %c0_i32, %c0_i32_0 : i32, i32
  }
  func.func @transform_7(%arg0: i32) -> (i32, i32) {
    %c0_i32 = arith.constant 0 : i32
    %c0_i32_0 = arith.constant 0 : i32
    return %arg0, %c0_i32 : i32, i32
  }
}

</mosaic_0001>

<bundles_post_ra>
// kernel: tpu_custom_call.1
= control target key start
LH: loop header
LB: loop body
LE: loop exit
PB: predicated region body
PF: predicated region fallthrough
CT: control target
= control target key end

     0   :  { %vm37_vm0 = vcmask 64512   ;;  %v118_v2 = vmov 0   ;;  %v119_v4 = vmov 1   ;;  %vm80_vm1 = vcmask 130048   ;;  %s187_s2 = inlined_call_operand.vmem [shape: f32[8,16], index: 2, kind: input, shape index: {}]   ;;  %s188_s0 = inlined_call_operand.vmem [shape: f32[8,8], index: 0, kind: input, shape index: {}]   ;;  %s189_s1 = inlined_call_operand.vmem [shape: f32[8,2], index: 1, kind: input, shape index: {}]   ;;  %s190_s4 = inlined_call_operand.vmem [shape: f32[1,16], index: 4, kind: input, shape index: {}]   ;;  %s191_s6 = inlined_call_operand.vmem [shape: f32[1,2], index: 6, kind: input, shape index: {}]   ;;  %s192_s5 = inlined_call_operand.vmem [shape: f32[16,2], index: 5, kind: input, shape index: {}]   ;;  %s193_s3 = inlined_call_operand.vmem [shape: f32[2,16], index: 3, kind: input, shape index: {}]   ;;  %s194_s7 = inlined_call_operand.vmem [shape: f32[8,2], index: 7, kind: output, shape index: {}]  }
   0x1   :  { %v29_v0 = vld [vmem:[%s187_s2] sm:$0xff]  ;;  %114 = vset.pattern.permute.xlu0 %v118_v2  ;;  %v75_v5 = vld [vmem:[%s192_s5 + $0x8] sm:$0xff]  ;;  %vm104_vm2 = vcmask 15360  }
   0x2   :  { %v26_v1 = vld [vmem:[%s188_s0] sm:$0xff]  ;;  %56 = vmatpush.msra.mxu0 %v29_v0  ;;  %98 = vmatpush.msra.mxu1 %v75_v5 }
   0x3   :  { %v27_v3 = vld [vmem:[%s189_s1] sm:$0xff]  ;;  %110 = vmatmul.msk.f32.vlgmr.msra.gmra.mxu0 %vm37_vm0, %v26_v1 }
   0x4   :  { %32 = vperm.xlu0 %114, %v27_v3   ;;  %v74_v6 = vld [vmem:[%s192_s5] sm:$0xff] }
   0x5   :  { %99 = vmatpush.msra.mxu1 %v74_v6  ;;  %v28_v8 = vld [vmem:[%s193_s3] sm:$0x3] }
   0x6   :  { %v35_v9 = vperm.slane %v28_v8, 0  ;;  %v65_v10 = vperm.slane %v28_v8, 1  ;;  %v116_v16 = vld [vmem:[%s190_s4] ss:$0 sm:$0xff] }
   0x7   :  { %v117_v20 = vld [vmem:[%s191_s6] ss:$0 sm:$0xff] }
   0xc   :  { %115 = vset.pattern.permute.xlu0 %v119_v4 }
   0xd   :  { %62 = vperm.xlu0 %115, %v27_v3  }
  0x76   :  { %v33_v7 = vpop.permute.xlu0 %32 }
  0x77   :  { %v36_v12 = vmul.f32 %v35_v9, %v33_v7 }
  0x7f   :  { %v63_v11 = vpop.permute.xlu0 %62 }
  0x80   :  { %v66_v13 = vmul.f32 %v65_v10, %v63_v11  ;;  %v58_v14 = vpop.f32.mrf.mxu0 }
  0x81   :  { %v59_v15 = vadd.f32 %v58_v14, %v36_v12 }
  0x83   :  { %v67_v17 = vadd.f32 %v66_v13, %v59_v15 }
  0x85   :  { %v72_v18 = vadd.f32 %v116_v16, %v67_v17 }
  0x87   :  { %v73_v19 = vmax.f32 %v72_v18, 0.0 }
  0x89   :  { %111 = vmatmul.msk.f32.vlgmr.msra.gmra.mxu1 %vm80_vm1, %v73_v19 }
 0x106   :  { %v101_v21 = vpop.f32.mrf.mxu1 }
 0x107   :  { %v102_v22 = vadd.f32 %v117_v20, %v101_v21 }
 0x109   :  { %105 = vst.msk [vmem:[%s194_s7] sm:$0xff] %vm104_vm2, %v102_v22 }

</bundles_post_ra>
